<compile_context>
chip_gen: v7x
topology: tpu7x:2x2x1
jax: 0.10.0
libtpu: 0.0.40
codegen_flags: <defaults>
</compile_context>

<pallas_src>
import functools

import jax
import jax.numpy as jnp
from jax.experimental import pallas as pl
from jax.experimental.pallas import tpu as pltpu

_HIGH = jax.lax.Precision.HIGHEST


# ------------------------------ kernel helpers ------------------------------
def _taps(v, offsets, length):
    """Shifted copies of v (rows, c) along rows, concatenated over channels.

    taps[:, j*c:(j+1)*c][r] = v[r + offsets[j]] within each length-`length`
    sequence (rows are whole sequences stacked back to back), zero where the
    shift would cross a sequence boundary.  Built entirely in registers:
    pltpu.roll is XLU work and the halo mask is a VPU select — no im2col VMEM
    scratch and no masked stores.
    """
    rows, c = v.shape
    pos = jax.lax.broadcasted_iota(jnp.int32, (rows, c), 0) % length
    cols = []
    for d in offsets:
        if d == 0:
            cols.append(v)
        else:
            rolled = pltpu.roll(v, shift=(-d) % rows, axis=0)
            valid = jnp.logical_and(pos + d >= 0, pos + d < length)
            cols.append(jnp.where(valid, rolled, 0.0))
    return jnp.concatenate(cols, axis=1)


def _stage1(x_ref, w1_ref, length):
    # branch1 / branch2a / branch3a (1x1, centre tap) and branch4
    # (avgpool3 + 1x1 == 3-tap conv with every tap W4/3) as ONE matmul.
    x3 = _taps(x_ref[...], (-1, 0, 1), length)                  # (rows, 3*cin)
    return jnp.dot(x3, w1_ref[...], preferred_element_type=jnp.float32,
                   precision=_HIGH)                             # (rows, 4*cout)


def _stage2(a1, w2_ref, length, cout):
    # branch2b (3-tap, zero-padded to 5 taps) and branch3b (5-tap) as ONE
    # matmul on the [h2a | h3a] activation slab.
    h5 = _taps(a1[:, cout:3 * cout], (-2, -1, 0, 1, 2), length)  # (rows, 10*cout)
    return jnp.dot(h5, w2_ref[...], preferred_element_type=jnp.float32,
                   precision=_HIGH)                              # (rows, 2*cout)


def _bn_apply(s, scale_ref, shift_ref):
    return jnp.maximum(s * scale_ref[...] + shift_ref[...], 0.0)


def _accumulate(s, sum_ref, ssq_ref):
    @pl.when(pl.program_id(0) == 0)
    def _():
        sum_ref[...] = jnp.zeros_like(sum_ref)
        ssq_ref[...] = jnp.zeros_like(ssq_ref)
    sum_ref[...] += jnp.sum(s, axis=0, keepdims=True)
    ssq_ref[...] += jnp.sum(s * s, axis=0, keepdims=True)


# --------------------------------- kernels ----------------------------------
def _stats1_kernel(x_ref, w1_ref, sum_ref, ssq_ref, *, length):
    _accumulate(_stage1(x_ref, w1_ref, length), sum_ref, ssq_ref)


def _stats2_kernel(x_ref, w1_ref, sc1_ref, sh1_ref, w2_ref, sum_ref, ssq_ref,
                   *, length, cout):
    a1 = _bn_apply(_stage1(x_ref, w1_ref, length), sc1_ref, sh1_ref)
    _accumulate(_stage2(a1, w2_ref, length, cout), sum_ref, ssq_ref)


def _final_kernel(x_ref, w1_ref, sc1_ref, sh1_ref, w2_ref, sc2_ref, sh2_ref,
                  out_ref, *, length, cout):
    a1 = _bn_apply(_stage1(x_ref, w1_ref, length), sc1_ref, sh1_ref)
    a2 = _bn_apply(_stage2(a1, w2_ref, length, cout), sc2_ref, sh2_ref)
    # one lane-dense (rows, 4*cout) store instead of four 32-lane stripes
    out_ref[...] = jnp.concatenate(
        [a1[:, 0:cout],                 # branch1
         a2[:, 0:cout],                 # branch2
         a2[:, cout:2 * cout],          # branch3
         a1[:, 3 * cout:4 * cout]],     # branch4
        axis=1)


# --------------------------------- wrapper ----------------------------------
def _pick_seqs_per_tile(n, length, requested):
    # Cap the row tile so double-buffered activations stay well inside VMEM
    # (matters most on v7x's 64 MiB/TC).  Tiles are whole sequences so the
    # conv halos and BN statistics never see padded rows.
    if requested is None:
        requested = max(1, 2048 // max(length, 1))
    nb = max(1, min(n, requested))
    while n % nb:
        nb -= 1
    if (nb * length) % 8 != 0 and nb != n:
        nb = n          # full-array row block is always a legal BlockSpec
    return nb


def _fold_stats(sums, ssqs, gamma, beta, inv_rows, eps):
    mean = sums * inv_rows
    var = jnp.maximum(ssqs * inv_rows - mean * mean, 0.0)
    scale = gamma * jax.lax.rsqrt(var + eps)
    return scale, beta - mean * scale


def inception_module(x_ncl, params, *, eps=1e-5, seqs_per_tile=None):
    """Pallas implementation. x_ncl: (N, Cin, L) float32 -> (N, 4*Cout, L)."""
    x_ncl = x_ncl.astype(jnp.float32)
    n, cin, length = x_ncl.shape
    cout = params["b1_w"].shape[0]

    def w_1x1(w):                       # (Cout, Cin, 1) -> (Cin, Cout)
        return jnp.transpose(w[:, :, 0], (1, 0)).astype(jnp.float32)

    def vec(*vs):
        return jnp.concatenate(
            [v.reshape(-1) for v in vs]).reshape(1, -1).astype(jnp.float32)

    # stage-1 fused weight (3*cin, 4*cout): 1x1 convs on the centre tap;
    # branch4 (avgpool3+1x1, count_include_pad=True) is W4/3 on all 3 taps.
    w1 = jnp.zeros((3 * cin, 4 * cout), jnp.float32)
    w1 = w1.at[cin:2 * cin, 0 * cout:1 * cout].set(w_1x1(params["b1_w"]))
    w1 = w1.at[cin:2 * cin, 1 * cout:2 * cout].set(w_1x1(params["b2a_w"]))
    w1 = w1.at[cin:2 * cin, 2 * cout:3 * cout].set(w_1x1(params["b3a_w"]))
    w4c = w_1x1(params["b4_w"]) / 3.0
    for j in range(3):
        w1 = w1.at[j * cin:(j + 1) * cin, 3 * cout:4 * cout].set(w4c)

    # stage-2 fused weight (5*2*cout, 2*cout) on the [h2a | h3a] taps.
    w2 = jnp.zeros((5 * 2 * cout, 2 * cout), jnp.float32)
    for k in range(3):                              # branch2b: tap k -> d = k-1
        j = (k - 1) + 2
        w2 = w2.at[j * 2 * cout:j * 2 * cout + cout, 0:cout].set(
            jnp.transpose(params["b2b_w"][:, :, k], (1, 0)).astype(jnp.float32))
    for k in range(5):                              # branch3b: tap k -> d = k-2
        j = k
        w2 = w2.at[j * 2 * cout + cout:(j + 1) * 2 * cout, cout:2 * cout].set(
            jnp.transpose(params["b3b_w"][:, :, k], (1, 0)).astype(jnp.float32))

    g1 = vec(params["b1_g"], params["b2a_g"], params["b3a_g"], params["b4_g"])
    be1 = vec(params["b1_b"], params["b2a_b"], params["b3a_b"], params["b4_b"])
    g2 = vec(params["b2b_g"], params["b3b_g"])
    be2 = vec(params["b2b_b"], params["b3b_b"])

    # channels-last, batch folded into the matmul M dim.
    # TODO(synk): keep activations channels-last end-to-end at the model level;
    # these wrapper transposes are pure HBM layout traffic around the kernel.
    x_flat = jnp.transpose(x_ncl, (0, 2, 1)).reshape(n * length, cin)

    nb = _pick_seqs_per_tile(n, length, seqs_per_tile)
    rows_tile = nb * length
    grid = (n // nb,)
    inv_rows = jnp.float32(1.0 / (n * length))

    x_spec = pl.BlockSpec((rows_tile, cin), lambda t: (t, 0))
    w1_spec = pl.BlockSpec(w1.shape, lambda t: (0, 0))
    w2_spec = pl.BlockSpec(w2.shape, lambda t: (0, 0))
    v1_spec = pl.BlockSpec((1, 4 * cout), lambda t: (0, 0))
    v2_spec = pl.BlockSpec((1, 2 * cout), lambda t: (0, 0))
    stat1_shape = jax.ShapeDtypeStruct((1, 4 * cout), jnp.float32)
    stat2_shape = jax.ShapeDtypeStruct((1, 2 * cout), jnp.float32)

    seq = pltpu.CompilerParams(dimension_semantics=("arbitrary",))  # accumulation
    par = pltpu.CompilerParams(dimension_semantics=("parallel",))   # megacore

    # pass 1: stage-1 conv batch statistics (per-channel sum / sumsq)
    sum1, ssq1 = pl.pallas_call(
        functools.partial(_stats1_kernel, length=length),
        out_shape=(stat1_shape, stat1_shape),
        grid=grid,
        in_specs=[x_spec, w1_spec],
        out_specs=(v1_spec, v1_spec),
        compiler_params=seq,
    )(x_flat, w1)
    sc1, sh1 = _fold_stats(sum1, ssq1, g1, be1, inv_rows, eps)

    # pass 2: stage-2 conv batch statistics (needs the finalized stage-1 BN)
    sum2, ssq2 = pl.pallas_call(
        functools.partial(_stats2_kernel, length=length, cout=cout),
        out_shape=(stat2_shape, stat2_shape),
        grid=grid,
        in_specs=[x_spec, w1_spec, v1_spec, v1_spec, w2_spec],
        out_specs=(v2_spec, v2_spec),
        compiler_params=seq,
    )(x_flat, w1, sc1, sh1, w2)
    sc2, sh2 = _fold_stats(sum2, ssq2, g2, be2, inv_rows, eps)

    # pass 3: normalize + ReLU + one lane-dense 4*cout-wide store per row tile
    out_flat = pl.pallas_call(
        functools.partial(_final_kernel, length=length, cout=cout),
        out_shape=jax.ShapeDtypeStruct((n * length, 4 * cout), jnp.float32),
        grid=grid,
        in_specs=[x_spec, w1_spec, v1_spec, v1_spec, w2_spec, v2_spec, v2_spec],
        out_specs=pl.BlockSpec((rows_tile, 4 * cout), lambda t: (t, 0)),
        compiler_params=par,
    )(x_flat, w1, sc1, sh1, w2, sc2, sh2)

    out_nlc = out_flat.reshape(n, length, 4 * cout)
    return jnp.transpose(out_nlc, (0, 2, 1))                   # (N, 4*Cout, L)


# ----------------------------- pure-JAX reference -----------------------------
def _conv1d_ref(x, w, pad):
    dn = jax.lax.conv_dimension_numbers(x.shape, w.shape, ("NCH", "OIH", "NCH"))
    return jax.lax.conv_general_dilated(x, w, (1,), [(pad, pad)],
                                        dimension_numbers=dn, precision=_HIGH)


def _bn_relu_ref(x, g, b, eps=1e-5):
    m = jnp.mean(x, axis=(0, 2), keepdims=True)
    v = jnp.mean((x - m) ** 2, axis=(0, 2), keepdims=True)
    y = (x - m) * jax.lax.rsqrt(v + eps) * g.reshape(1, -1, 1) + b.reshape(1, -1, 1)
    return jax.nn.relu(y)


def inception_module_ref(x, p, *, eps=1e-5):
    length = x.shape[2]
    o1 = _bn_relu_ref(_conv1d_ref(x, p["b1_w"], 0), p["b1_g"], p["b1_b"], eps)
    h2 = _bn_relu_ref(_conv1d_ref(x, p["b2a_w"], 0), p["b2a_g"], p["b2a_b"], eps)
    o2 = _bn_relu_ref(_conv1d_ref(h2, p["b2b_w"], 1), p["b2b_g"], p["b2b_b"], eps)
    h3 = _bn_relu_ref(_conv1d_ref(x, p["b3a_w"], 0), p["b3a_g"], p["b3a_b"], eps)
    o3 = _bn_relu_ref(_conv1d_ref(h3, p["b3b_w"], 2), p["b3b_g"], p["b3b_b"], eps)
    xp = jnp.pad(x, ((0, 0), (0, 0), (1, 1)))   # AvgPool1d(3,1,1), count_include_pad
    pool = (xp[:, :, 0:length] + xp[:, :, 1:length + 1] + xp[:, :, 2:length + 2]) / 3.0
    o4 = _bn_relu_ref(_conv1d_ref(pool, p["b4_w"], 0), p["b4_g"], p["b4_b"], eps)
    return jnp.concatenate([o1, o2, o3, o4], axis=1)


def make_params(key, cin, cout):
    ks = jax.random.split(key, 18)

    def conv(k, co, ci, ksz):
        return 0.2 * jax.random.normal(k, (co, ci, ksz), jnp.float32)

    def gamma(k):
        return 1.0 + 0.1 * jax.random.normal(k, (cout,), jnp.float32)

    def beta(k):
        return 0.1 * jax.random.normal(k, (cout,), jnp.float32)

    return {
        "b1_w": conv(ks[0], cout, cin, 1),   "b1_g": gamma(ks[1]),  "b1_b": beta(ks[2]),
        "b2a_w": conv(ks[3], cout, cin, 1),  "b2a_g": gamma(ks[4]), "b2a_b": beta(ks[5]),
        "b2b_w": conv(ks[6], cout, cout, 3), "b2b_g": gamma(ks[7]), "b2b_b": beta(ks[8]),
        "b3a_w": conv(ks[9], cout, cin, 1),  "b3a_g": gamma(ks[10]), "b3a_b": beta(ks[11]),
        "b3b_w": conv(ks[12], cout, cout, 5), "b3b_g": gamma(ks[13]), "b3b_b": beta(ks[14]),
        "b4_w": conv(ks[15], cout, cin, 1),  "b4_g": gamma(ks[16]), "b4_b": beta(ks[17]),
    }


if __name__ == "__main__":
    key = jax.random.PRNGKey(0)
    kx, kp = jax.random.split(key)

    # in_channels=16, out_channels=32 -> concatenated output has 4*32 = 128
    # channels (one full lane width): (2, 16, 16) -> (2, 128, 16).
    n, cin, cout, length = 2, 16, 32, 16
    x = jax.random.normal(kx, (n, cin, length), jnp.float32)
    params = make_params(kp, cin, cout)

    # seqs_per_tile=1 -> 2 row tiles: exercises the multi-tile multi-pass BN.
    out = inception_module(x, params, seqs_per_tile=1)
    ref = inception_module_ref(x, params)
    jax.block_until_ready((out, ref))

    assert out.shape == (n, 4 * cout, length) and out.shape == ref.shape
    max_err = float(jnp.max(jnp.abs(out - ref)))
    assert jnp.allclose(out, ref, atol=1e-3, rtol=1e-3), max_err
    print("KERNEL_OK")
</pallas_src>

<mosaic_0001>
module attributes {stable_mosaic.version = 11 : i64} {
  func.func @_stats1_kernel(%arg0: i32, %arg1: memref<16x16xf32, #tpu.memory_space<vmem>>, %arg2: memref<48x128xf32, #tpu.memory_space<vmem>>, %arg3: memref<1x128xf32, #tpu.memory_space<vmem>>, %arg4: memref<1x128xf32, #tpu.memory_space<vmem>>) attributes {dimension_semantics = [#tpu.dimension_semantics<arbitrary>], iteration_bounds = array<i64: 2>, scalar_prefetch = 0 : i64, scratch_operands = 0 : i64, tpu.core_type = #tpu.core_type<tc>, window_params = [{transform_indices = @transform_0, window_bounds = array<i64: 16, 16>}, {pipeline_mode = #tpu.pipeline_mode<synchronous>, transform_indices = @transform_1, window_bounds = array<i64: 48, 128>}, {pipeline_mode = #tpu.pipeline_mode<synchronous>, transform_indices = @transform_2, window_bounds = array<i64: 1, 128>}, {pipeline_mode = #tpu.pipeline_mode<synchronous>, transform_indices = @transform_3, window_bounds = array<i64: 1, 128>}]} {
    %c0 = arith.constant 0 : index
    %c0_0 = arith.constant 0 : index
    %0 = vector.load %arg1[%c0, %c0_0] : memref<16x16xf32, #tpu.memory_space<vmem>>, vector<16x16xf32>
    %1 = tpu.iota {dimensions = array<i32: 0>} : vector<16x16xi32>
    %c16_i32 = arith.constant 16 : i32
    %c0_i32 = arith.constant 0 : i32
    %2 = arith.cmpi eq, %c16_i32, %c0_i32 : i32
    %c1_i32 = arith.constant 1 : i32
    %3 = arith.select %2, %c1_i32, %c16_i32 : i32
    %4 = vector.broadcast %3 : i32 to vector<16x16xi32>
    %5 = arith.remsi %1, %4 : vector<16x16xi32>
    %c0_i32_1 = arith.constant 0 : i32
    %6 = vector.broadcast %c0_i32_1 : i32 to vector<16x16xi32>
    %7 = arith.cmpi ne, %5, %6 : vector<16x16xi32>
    %c0_i32_2 = arith.constant 0 : i32
    %8 = vector.broadcast %c0_i32_2 : i32 to vector<16x16xi32>
    %9 = arith.cmpi slt, %5, %8 : vector<16x16xi32>
    %c0_i32_3 = arith.constant 0 : i32
    %10 = arith.cmpi slt, %3, %c0_i32_3 : i32
    %11 = vector.broadcast %10 : i1 to vector<16x16xi1>
    %12 = vector.broadcast %11 : vector<16x16xi1> to vector<16x16xi1>
    %13 = arith.xori %9, %12 : vector<16x16xi1>
    %14 = arith.andi %13, %7 : vector<16x16xi1>
    %15 = vector.broadcast %3 : i32 to vector<16x16xi32>
    %16 = arith.addi %5, %15 : vector<16x16xi32>
    %17 = arith.select %14, %16, %5 : vector<16x16xi1>, vector<16x16xi32>
    %c1_i32_4 = arith.constant 1 : i32
    %18 = tpu.dynamic_rotate %0 by %c1_i32_4 dim 0 : vector<16x16xf32>, i32 -> vector<16x16xf32>
    %c-1_i32 = arith.constant -1 : i32
    %19 = vector.broadcast %c-1_i32 : i32 to vector<16x16xi32>
    %20 = arith.addi %17, %19 : vector<16x16xi32>
    %c0_i32_5 = arith.constant 0 : i32
    %21 = vector.broadcast %c0_i32_5 : i32 to vector<16x16xi32>
    %22 = arith.cmpi sge, %20, %21 : vector<16x16xi32>
    %c-1_i32_6 = arith.constant -1 : i32
    %23 = vector.broadcast %c-1_i32_6 : i32 to vector<16x16xi32>
    %24 = arith.addi %17, %23 : vector<16x16xi32>
    %c16_i32_7 = arith.constant 16 : i32
    %25 = vector.broadcast %c16_i32_7 : i32 to vector<16x16xi32>
    %26 = arith.cmpi slt, %24, %25 : vector<16x16xi32>
    %27 = arith.andi %22, %26 : vector<16x16xi1>
    %cst = arith.constant 0.000000e+00 : f32
    %28 = vector.broadcast %cst : f32 to vector<16x16xf32>
    %29 = arith.select %27, %18, %28 : vector<16x16xi1>, vector<16x16xf32>
    %c15_i32 = arith.constant 15 : i32
    %30 = tpu.dynamic_rotate %0 by %c15_i32 dim 0 : vector<16x16xf32>, i32 -> vector<16x16xf32>
    %c1_i32_8 = arith.constant 1 : i32
    %31 = vector.broadcast %c1_i32_8 : i32 to vector<16x16xi32>
    %32 = arith.addi %17, %31 : vector<16x16xi32>
    %c0_i32_9 = arith.constant 0 : i32
    %33 = vector.broadcast %c0_i32_9 : i32 to vector<16x16xi32>
    %34 = arith.cmpi sge, %32, %33 : vector<16x16xi32>
    %c1_i32_10 = arith.constant 1 : i32
    %35 = vector.broadcast %c1_i32_10 : i32 to vector<16x16xi32>
    %36 = arith.addi %17, %35 : vector<16x16xi32>
    %c16_i32_11 = arith.constant 16 : i32
    %37 = vector.broadcast %c16_i32_11 : i32 to vector<16x16xi32>
    %38 = arith.cmpi slt, %36, %37 : vector<16x16xi32>
    %39 = arith.andi %34, %38 : vector<16x16xi1>
    %cst_12 = arith.constant 0.000000e+00 : f32
    %40 = vector.broadcast %cst_12 : f32 to vector<16x16xf32>
    %41 = arith.select %39, %30, %40 : vector<16x16xi1>, vector<16x16xf32>
    %42 = tpu.concatenate %29, %0, %41 in 1 : vector<16x16xf32>, vector<16x16xf32>, vector<16x16xf32> -> vector<16x48xf32>
    %c0_13 = arith.constant 0 : index
    %c0_14 = arith.constant 0 : index
    %43 = vector.load %arg2[%c0_13, %c0_14] : memref<48x128xf32, #tpu.memory_space<vmem>>, vector<48x128xf32>
    %cst_15 = arith.constant dense<0.000000e+00> : vector<16x128xf32>
    %44 = tpu.matmul %42, %43, %cst_15 {dimension_numbers = #tpu.dot_dimension_numbers<[1], [0], [0], [1], [0, 0, 1, 1], [], []>, precision = #tpu.contract_precision<fp32>} : vector<16x48xf32>, vector<48x128xf32>, vector<16x128xf32> -> vector<16x128xf32>
    %c0_i32_16 = arith.constant 0 : i32
    %45 = arith.cmpi eq, %arg0, %c0_i32_16 : i32
    %46 = arith.extui %45 : i1 to i32
    %c0_i32_17 = arith.constant 0 : i32
    %47 = arith.cmpi ne, %46, %c0_i32_17 : i32
    scf.if %47 {
      %cst_28 = arith.constant 0.000000e+00 : f32
      %59 = vector.broadcast %cst_28 : f32 to vector<1x128xf32>
      %c0_29 = arith.constant 0 : index
      %c0_30 = arith.constant 0 : index
      %60 = vector.load %arg3[%c0_29, %c0_30] : memref<1x128xf32, #tpu.memory_space<vmem>>, vector<1x128xf32>
      tpu.vector_store %arg3[%c0_29, %c0_30], %59 {strides = array<i32>} : memref<1x128xf32, #tpu.memory_space<vmem>>, vector<1x128xf32>,
      %cst_31 = arith.constant 0.000000e+00 : f32
      %61 = vector.broadcast %cst_31 : f32 to vector<1x128xf32>
      %c0_32 = arith.constant 0 : index
      %c0_33 = arith.constant 0 : index
      %62 = vector.load %arg4[%c0_32, %c0_33] : memref<1x128xf32, #tpu.memory_space<vmem>>, vector<1x128xf32>
      tpu.vector_store %arg4[%c0_32, %c0_33], %61 {strides = array<i32>} : memref<1x128xf32, #tpu.memory_space<vmem>>, vector<1x128xf32>,
    } else {
    }
    %c0_18 = arith.constant 0 : index
    %c0_19 = arith.constant 0 : index
    %48 = vector.load %arg3[%c0_18, %c0_19] : memref<1x128xf32, #tpu.memory_space<vmem>>, vector<1x128xf32>
    %cst_20 = arith.constant dense<0.000000e+00> : vector<128xf32>
    %49 = vector.multi_reduction <add>, %44, %cst_20 [0] : vector<16x128xf32> to vector<128xf32>
    %50 = vector.shape_cast %49 : vector<128xf32> to vector<1x128xf32>
    %51 = arith.addf %48, %50 : vector<1x128xf32>
    %c0_21 = arith.constant 0 : index
    %c0_22 = arith.constant 0 : index
    %52 = vector.load %arg3[%c0_21, %c0_22] : memref<1x128xf32, #tpu.memory_space<vmem>>, vector<1x128xf32>
    tpu.vector_store %arg3[%c0_21, %c0_22], %51 {strides = array<i32>} : memref<1x128xf32, #tpu.memory_space<vmem>>, vector<1x128xf32>,
    %c0_23 = arith.constant 0 : index
    %c0_24 = arith.constant 0 : index
    %53 = vector.load %arg4[%c0_23, %c0_24] : memref<1x128xf32, #tpu.memory_space<vmem>>, vector<1x128xf32>
    %54 = arith.mulf %44, %44 : vector<16x128xf32>
    %cst_25 = arith.constant dense<0.000000e+00> : vector<128xf32>
    %55 = vector.multi_reduction <add>, %54, %cst_25 [0] : vector<16x128xf32> to vector<128xf32>
    %56 = vector.shape_cast %55 : vector<128xf32> to vector<1x128xf32>
    %57 = arith.addf %53, %56 : vector<1x128xf32>
    %c0_26 = arith.constant 0 : index
    %c0_27 = arith.constant 0 : index
    %58 = vector.load %arg4[%c0_26, %c0_27] : memref<1x128xf32, #tpu.memory_space<vmem>>, vector<1x128xf32>
    tpu.vector_store %arg4[%c0_26, %c0_27], %57 {strides = array<i32>} : memref<1x128xf32, #tpu.memory_space<vmem>>, vector<1x128xf32>,
    return
  }
  func.func @transform_0(%arg0: i32) -> (i32, i32) {
    %c0_i32 = arith.constant 0 : i32
    %c0_i32_0 = arith.constant 0 : i32
    return %arg0, %c0_i32 : i32, i32
  }
  func.func @transform_1(%arg0: i32) -> (i32, i32) {
    %c0_i32 = arith.constant 0 : i32
    %c0_i32_0 = arith.constant 0 : i32
    %c0_i32_1 = arith.constant 0 : i32
    return %c0_i32, %c0_i32_0 : i32, i32
  }
  func.func @transform_2(%arg0: i32) -> (i32, i32) {
    %c0_i32 = arith.constant 0 : i32
    %c0_i32_0 = arith.constant 0 : i32
    %c0_i32_1 = arith.constant 0 : i32
    return %c0_i32, %c0_i32_0 : i32, i32
  }
  func.func @transform_3(%arg0: i32) -> (i32, i32) {
    %c0_i32 = arith.constant 0 : i32
    %c0_i32_0 = arith.constant 0 : i32
    %c0_i32_1 = arith.constant 0 : i32
    return %c0_i32, %c0_i32_0 : i32, i32
  }
}

</mosaic_0001>

<bundles_post_ra>
// kernel: tpu_custom_call.1
= control target key start
LH: loop header
LB: loop body
LE: loop exit
PB: predicated region body
PF: predicated region fallthrough
CT: control target
= control target key end

     0   :  { %9 = vsyncpa [#allocation3], 0  ;;  %s1380_s0 = inlined_call_operand.vmem [shape: f32[32,16], index: 0, kind: input, shape index: {}]   ;;  %s1381_s1 = inlined_call_operand.vmem [shape: f32[48,128], index: 1, kind: input, shape index: {}]   ;;  %s1382_s2 = inlined_call_operand.hbm [shape: f32[1,128], index: 2, kind: output, shape index: {0}]   ;;  %s1383_s3 = inlined_call_operand.hbm [shape: f32[1,128], index: 3, kind: output, shape index: {1}]  }
   0x1   :  { %10 = vsyncpa [#allocation5], 0  ;;  %s1253_s12 = smov 0  }
   0x2 LB: > { %s1259_s13 = sadd.s32 4294967295, %s1226_s12   ;;  %p905_p0 = scmp.ge.s32.totalorder %s1226_s12, 1  ;;  %s1226_s12 = sphi %s1253_s12, %s16_s12  }
   0x3   : > { %p133_p1 = scmp.lt.s32.totalorder %s1226_s12, 3 }
   0x5   : > { %p134_p2 = pnand %p905_p0, %p133_p1 }
   0x6   : > { %s906_s14 = sshll.u32 (!%p134_p2), %s1259_s13, 1  ;;  %v160_v0 = vlaneseq (!%p134_p2)  ;;  %v239_v1 = vld [vmem:[%s1381_s1] sm:$0xff] (!%p134_p2)  ;;  %v240_v2 = vld [vmem:[%s1381_s1 + $0x8] sm:$0xff] (!%p134_p2)  ;;  %v241_v5 = vld [vmem:[%s1381_s1 + $0x10] sm:$0xff] (!%p134_p2)  ;;  %s1228_s4 = smov (!%p134_p2), 16   ;;  %vm233_vm4 = vcmask (!%p134_p2), 130048  }
   0x7   : > { %137 = sbr.rel (%p134_p2) target bundleno = 445 (0x1bd), region = 28  ;;  %p153_p3 = scmp.lt.s32.totalorder (!%p134_p2), %s906_s14, 3  ;;  %v253_v3 = vand.u32 (!%p134_p2), 4294901760, %v239_v1  ;;  %v256_v4 = vand.u32 (!%p134_p2), 4294901760, %v240_v2  ;;  %v242_v7 = vld [vmem:[%s1381_s1 + $0x18] sm:$0xff] (!%p134_p2)  ;;  %v259_v8 = vand.u32 (!%p134_p2), 4294901760, %v241_v5 }
   0x8   : > { %v161_v6 = vshrl.u32 (!%p134_p2), %v160_v0, 7  ;;  %v243_v9 = vld [vmem:[%s1381_s1 + $0x20] sm:$0xff] (!%p134_p2)  ;;  %v244_v10 = vld [vmem:[%s1381_s1 + $0x28] sm:$0xff] (!%p134_p2)  ;;  %v262_v12 = vand.u32 (!%p134_p2), 4294901760, %v242_v7  ;;  %s1229_s5 = smov (!%p134_p2), 32   ;;  %vm236_vm5 = vcmask (!%p134_p2), 261120  }
   0x9   : > { %v1282_v11 = vpack.c.bf16 (!%p134_p2), %v256_v4, %v253_v3  ;;  %v265_v13 = vand.u32 (!%p134_p2), 4294901760, %v243_v9  ;;  %v268_v14 = vand.u32 (!%p134_p2), 4294901760, %v244_v10  ;;  %v1288_v18 = vsub.f32 (!%p134_p2), %v239_v1, %v253_v3  ;;  %p908_p4 = scmp.ne.s32.totalorder (!%p134_p2), %s1259_s13, 0 }
   0xa   : > { %v162_v15 = vadd.s32 (!%p134_p2), 8, %v161_v6  ;;  %v167_v16 = vand.u32 (!%p134_p2), 15, %v161_v6  ;;  %v1286_v17 = vpack.c.bf16 (!%p134_p2), %v262_v12, %v259_v8  ;;  %v1295_v21 = vsub.f32 (!%p134_p2), %v240_v2, %v256_v4 }
   0xb   : > { %1090 = vmatprep.subr.bf16.mxu0 (!%p134_p2), %v1282_v11  ;;  %1054 = vmatprep.subr.bf16.mxu1 (!%p134_p2), %v1282_v11  ;;  %vm204_vm0 = vcmp.lt.s32.totalorder (!%p134_p2), %v161_v6, 7  ;;  %vm189_vm1 = vcmp.lt.s32.totalorder (!%p134_p2), %v161_v6, 1  ;;  %v1299_v24 = vpack.c.bf16 (!%p134_p2), %v268_v14, %v265_v13  ;;  %v346_v25 = vand.u32 (!%p134_p2), 4294901760, %v1288_v18 }
   0xc   : > { %v174_v19 = vand.u32 (!%p134_p2), 15, %v162_v15  ;;  %v192_v20 = vadd.s32 (!%p134_p2), 4294967295, %v167_v16  ;;  %1092 = vmatpush3.bf16.msra.mxu0 (!%p134_p2), %v1282_v11  ;;  %1056 = vmatpush3.bf16.msra.mxu1 (!%p134_p2), %v1282_v11  ;;  %v353_v31 = vand.u32 (!%p134_p2), 4294901760, %v1295_v21  ;;  %v359_v42 = vsub.f32 (!%p134_p2), %v241_v5, %v259_v8 }
   0xd   : > { %1094 = vmatprep.subr.bf16.mxu0 (!%p134_p2), %v1286_v17  ;;  %1058 = vmatprep.subr.bf16.mxu1 (!%p134_p2), %v1286_v17  ;;  %v347_v32 = vsub.f32 (!%p134_p2), %v1288_v18, %v346_v25  ;;  %v366_v43 = vsub.f32 (!%p134_p2), %v242_v7, %v262_v12  ;;  %v373_v44 = vsub.f32 (!%p134_p2), %v243_v9, %v265_v13  ;;  %vm245_vm6 = vcmask (!%p134_p2), 392192  }
   0xe   : > { %s1385_s14 = smov (!%p153_p3, %s906_s14), 3  ;;  %v208_v30 = vadd.s32 1, %v174_v19  ;;  %vm194_vm2 = vcmp.ge.s32.totalorder %v192_v20, 0  ;;  %v1101_v38 = vpack.c.bf16 %v353_v31, %v346_v25  ;;  %v354_v41 = vsub.f32 %v1295_v21, %v353_v31 }
   0xf   : > { %s907_s27 = sshll.u32 %s1385_s14, 3  ;;  %v348_v39 = vand.u32 4294901760, %v347_v32  ;;  %v380_v45 = vsub.f32 %v244_v10, %v268_v14  ;;  %v360_v47 = vand.u32 4294901760, %v359_v42  ;;  %v367_v48 = vand.u32 4294901760, %v366_v43 }
  0x10   : > { %s156_s30 = scalar_lea.vmem %s1380_s0, %s907_s27  ;;  %1096 = vmatpush3.bf16.msra.mxu0 %v1286_v17  ;;  %vm212_vm3 = vcmp.lt.s32.totalorder %v208_v30, 16  ;;  %1060 = vmatpush3.bf16.msra.mxu1 %v1286_v17  ;;  %v355_v46 = vand.u32 4294901760, %v354_v41  ;;  %v374_v49 = vand.u32 4294901760, %v373_v44  ;;  %v1077_v0 = vpack.c.bf16 %v1295_v21, %v1288_v18 }
  0x11   : > { %v158_v22 = vld [vmem:[%s156_s30] sm:$0xff]  ;;  %v159_v23 = vld [vmem:[%s156_s30 + $0x8] sm:$0xff]  ;;  %1098 = vmatprep.subr.bf16.mxu0 %v1299_v24  ;;  %1062 = vmatprep.subr.bf16.mxu1 %v1299_v24  ;;  %v381_v50 = vand.u32 4294901760, %v380_v45  ;;  %v1105_v52 = vpack.c.bf16 %v367_v48, %v360_v47  ;;  %v361_v53 = vsub.f32 %v359_v42, %v360_v47  ;;  %v368_v54 = vsub.f32 %v366_v43, %v367_v48 }
  0x12   : > { %v188_v26 = vrot.slane %v159_v23, 7  ;;  %219 = vrot.lane.b32.xlu0 %v158_v22, %s1228_s4  ;;  %v187_v27 = vrot.slane %v158_v22, 7  ;;  %v202_v28 = vrot.slane %v158_v22, 1  ;;  %v203_v29 = vrot.slane %v159_v23, 1 }
  0x13   : > { %v1065_v51 = vpack.c.bf16 %v355_v46, %v348_v39  ;;  %v1109_v55 = vpack.c.bf16 %v381_v50, %v374_v49  ;;  %v375_v56 = vsub.f32 %v373_v44, %v374_v49  ;;  %v382_v57 = vsub.f32 %v380_v45, %v381_v50 }
  0x14   : > { %v205_v33 = vsel %vm204_vm0, %v202_v28, %v203_v29  ;;  %v206_v34 = vsel %vm204_vm0, %v203_v29, %v202_v28  ;;  %v191_v35 = vsel %vm189_vm1, %v188_v26, %v187_v27  ;;  %v190_v36 = vsel %vm189_vm1, %v187_v27, %v188_v26  ;;  %1100 = vmatpush3.bf16.msra.mxu0 %v1299_v24 }
  0x15   : > { %227 = vrot.lane.b32.xlu1 %v205_v33, %s1229_s5  ;;  %v200_v37 = vsel %vm194_vm2, %v191_v35, 0.0  ;;  %v216_v40 = vsel %vm212_vm3, %v206_v34, 0.0  ;;  %1102 = vmatprep.subr.bf16.mxu0 %v1101_v38  ;;  %v362_v58 = vand.u32 4294901760, %v361_v53  ;;  %v369_v59 = vand.u32 4294901760, %v368_v54 }
  0x16   : > { %221 = vrot.lane.b32.xlu0 %v159_v23, %s1228_s4  ;;  %1064 = vmatpush3.bf16.msra.mxu1 %v1299_v24  ;;  %v376_v60 = vand.u32 4294901760, %v375_v56  ;;  %v383_v61 = vand.u32 4294901760, %v382_v57  ;;  %v1081_v1 = vpack.c.bf16 %v366_v43, %v359_v42  ;;  %v1085_v2 = vpack.c.bf16 %v380_v45, %v373_v44 }
  0x17   : > { %1066 = vmatprep.subr.bf16.mxu1 %v1065_v51  ;;  %v1069_v62 = vpack.c.bf16 %v369_v59, %v362_v58 }
  0x18   : > { %v1073_v63 = vpack.c.bf16 %v383_v61, %v376_v60 }
  0x19   : > { %229 = vrot.lane.b32.xlu1 %v216_v40, %s1229_s5 }
  0x84   : > { %v220_v3 = vpop.permute.xlu0 %219 }
  0x85   : > { %v234_v4 = vsel %vm233_vm4, %v200_v37, %v220_v3 }
  0x87   : > { %v228_v5 = vpop.permute.xlu1 %227 }
  0x88   : > { %v237_v6 = vsel %vm236_vm5, %v234_v4, %v228_v5  ;;  %v222_v7 = vpop.permute.xlu0 %221 }
  0x89   : > { %v247_v8 = vsel %vm245_vm6, %v237_v6, 0  ;;  %v235_v9 = vsel %vm233_vm4, %v190_v36, %v222_v7 }
  0x8a   : > { %v323_v10 = vand.u32 4294901760, %v247_v8 }
  0x8b   : > { %v230_v12 = vpop.permute.xlu1 %229 }
  0x8c   : > { %v324_v13 = vsub.f32 %v247_v8, %v323_v10  ;;  %v238_v14 = vsel %vm236_vm5, %v235_v9, %v230_v12 }
  0x8d   : > { %v250_v15 = vsel %vm245_vm6, %v238_v14, 0 }
  0x8e   : > { %v333_v16 = vand.u32 4294901760, %v250_v15  ;;  %v325_v19 = vand.u32 4294901760, %v324_v13 }
  0x90   : > { %v334_v18 = vsub.f32 %v250_v15, %v333_v16  ;;  %1020 = vmatprep.mubr.f32.mxu0 %v325_v19  ;;  %v326_v20 = vsub.f32 %v324_v13, %v325_v19 }
  0x92   : > { %v327_v21 = vand.u32 4294901760, %v326_v20  ;;  %v335_v22 = vand.u32 4294901760, %v334_v18 }
  0x94   : > { %975 = vmatprep.mubr.f32.mxu1 %v327_v21  ;;  %1021 = vmatmul.mubr.f32.vlgmr.msra.gmra.mrb[0].mxu0 %v335_v22  ;;  %v336_v23 = vsub.f32 %v334_v18, %v335_v22 }
  0x95   : > { %1104 = vmatpush3.bf16.msra.mxu0 %v1101_v38  ;;  %1035 = vmatprep.mubr.f32.mxu0 %v323_v10 }
  0x96   : > { %1106 = vmatprep.subr.bf16.mxu0 %v1105_v52  ;;  %v337_v25 = vand.u32 4294901760, %v336_v23 }
  0x98   : > { %976 = vmatmul.mubr.f32.vlgmr.msra.gmra.mrb[0].mxu1 %v337_v25 }
  0x99   : > { %1068 = vmatpush3.bf16.msra.mxu1 %v1065_v51  ;;  %1108 = vmatpush3.bf16.msra.mxu0 %v1105_v52 }
  0x9a   : > { %990 = vmatprep.mubr.f32.mxu1 %v323_v10  ;;  %1070 = vmatprep.subr.bf16.mxu1 %v1069_v62 }
  0x9b   : > { %1110 = vmatprep.subr.bf16.mxu0 %v1109_v55 }
  0x9d   : > { %1072 = vmatpush3.bf16.msra.mxu1 %v1069_v62  ;;  %1112 = vmatpush3.bf16.msra.mxu0 %v1109_v55 }
  0x9e   : > { %1074 = vmatprep.subr.bf16.mxu1 %v1073_v63  ;;  %1114 = vmatprep.subr.bf16.mxu0 %v1282_v11 }
  0xa0   : > { %1036 = vmatmul.mubr.f32.vlgmr.msra.gmra.mrb[0].mxu0 %v333_v16 }
  0xa1   : > { %1076 = vmatpush3.bf16.msra.mxu1 %v1073_v63  ;;  %1116 = vmatpush3.bf16.msra.mxu0 %v1282_v11 }
  0xa2   : > { %1050 = vmatprep.mubr.f32.mxu0 %v323_v10  ;;  %1078 = vmatprep.subr.bf16.mxu1 %v1077_v0 }
  0xa3   : > { %1118 = vmatprep.subr.bf16.mxu0 %v1286_v17 }
  0xa4   : > { %991 = vmatmul.mubr.f32.vlgmr.msra.gmra.mrb[0].mxu1 %v333_v16 }
  0xa5   : > { %1080 = vmatpush3.bf16.msra.mxu1 %v1077_v0  ;;  %1005 = vmatprep.mubr.f32.mxu1 %v324_v13 }
  0xa6   : > { %1120 = vmatpush3.bf16.msra.mxu0 %v1286_v17  ;;  %1082 = vmatprep.subr.bf16.mxu1 %v1081_v1  ;;  %v1230_v17 = vmov (!%p908_p4), 0.0  }
  0xa7   : > { %1122 = vmatprep.subr.bf16.mxu0 %v1299_v24  ;;  %810 = vst [vmem:[#allocation2] sm:$0x1] (!%p908_p4), %v1230_v17  ;;  %811 = vst [vmem:[#allocation4] sm:$0x1] (!%p908_p4), %v1230_v17 }
  0xa9   : > { %1084 = vmatpush3.bf16.msra.mxu1 %v1081_v1 }
  0xaa   : > { %1124 = vmatpush3.bf16.msra.mxu0 %v1299_v24  ;;  %1086 = vmatprep.subr.bf16.mxu1 %v1085_v2 }
  0xad   : > { %1051 = vmatmul.mubr.f32.vlgmr.msra.gmra.mrb[0].mxu0 %v333_v16  ;;  %1088 = vmatpush3.bf16.msra.mxu1 %v1085_v2 }
  0xb0   : > { %1006 = vmatmul.mubr.f32.vlgmr.msra.gmra.mrb[0].mxu1 %v334_v18 }
 0x17f   : > { %809 = sbr.rel (%p908_p4) target bundleno = 390 (0x186), region = 32 }
 0x180   : > { %v1052_v11 = vpop.f32.mrb[0].mxu0 }
 0x181   : > { %v796_v26 = vpop.f32.mrb[1].mxu0 }
 0x183   : > { %v1007_v27 = vpop.f32.mrb[0].mxu1 }
 0x184   : > { %v1125_v28 = vadd.f32 %v1052_v11, %v1007_v27  ;;  %v530_v29 = vpop.f32.mrb[1].mxu1 }
 0x185   : > { %v1126_v30 = vadd.f32 %v796_v26, %v530_v29 }
 0x186 PF: > { %v824_v24 = vmul.f32 %v1125_v28, %v1125_v28  ;;  %v812_v43 = vld [vmem:[#allocation2] sm:$0x1]  ;;  %s1231_s6 = smov [#allocation2]   ;;  %v822_v46 = vld [vmem:[#allocation4] sm:$0x1]  ;;  %p1143_p5 = scmp.eq.s32.totalorder %s1259_s13, 1 }
 0x187   : > { %v813_v31 = vadd.f32 %v1126_v30, %v1125_v28  ;;  %v823_v32 = vmul.f32 %v1126_v30, %v1126_v30  ;;  %s841_s7 = sshll.u32 %s1231_s6, 4  ;;  %s1232_s8 = smov [#allocation4]   ;;  %s842_s7 = int_to_ptr.vmem [resolvable:$true] %s841_s7 }
 0x188   : > { %s852_s9 = sshll.u32 %s1232_s8, 4  ;;  %s1160_s10 = scalar_lea.vmem %s842_s7, 16  ;;  %s1325_s9 = int_to_ptr.vmem [resolvable:$true] %s852_s9 }
 0x189   : > { %v814_v33 = vrot.slane %v813_v31, 4  ;;  %v825_v34 = vadd.f32 %v824_v24, %v823_v32  ;;  %p1161_p6 = scmp.ne.s32.totalorder %s842_s7, %s1160_s10  ;;  %s1166_s11 = scalar_lea.vmem %s842_s7, 32 }
 0x18a   : > { %p1167_p9 = scmp.lt.s32.totalorder %s842_s7, %s842_s7  ;;  %p1168_p10 = scmp.lt.s32.totalorder %s1166_s11, %s1160_s10 }
 0x18b   : > { %v815_v35 = vadd.f32 %v814_v33, %v813_v31  ;;  %v826_v36 = vrot.slane %v825_v34, 4  ;;  %p1162_p7 = pnand %p1161_p6, %p1143_p5 }
 0x18c   : > { %p1169_p11 = por %p1168_p10, %p1167_p9 }
 0x18d   : > { %v816_v37 = vrot.slane %v815_v35, 2  ;;  %v827_v38 = vadd.f32 %v826_v36, %v825_v34  ;;  %p1163_p8 = pneg %p1162_p7 }
 0x18f   : > { %v817_v39 = vadd.f32 %v816_v37, %v815_v35  ;;  %v828_v40 = vrot.slane %v827_v38, 2  ;;  %p1170_p12 = pnand %p1169_p11, %p1163_p8 }
 0x191   : > { %v818_v41 = vrot.slane %v817_v39, 1  ;;  %v829_v42 = vadd.f32 %v828_v40, %v827_v38 }
 0x193   : > { %v819_v44 = vadd.f32 %v818_v41, %v817_v39  ;;  %v830_v45 = vrot.slane %v829_v42, 1 }
 0x195   : > { %v820_v47 = vadd.f32 %v819_v44, %v812_v43  ;;  %v831_v48 = vadd.f32 %v830_v45, %v829_v42 }
 0x197   : > { %821 = vst [vmem:[#allocation2] sm:$0x1] %v820_v47  ;;  %v832_v49 = vadd.f32 %v831_v48, %v822_v46 }
 0x198   : > { %1173 = shalt.err (!%p1170_p12)
}
 0x199   : > { %s1174_s16 = scalar_lea.hbm %s1382_s2, 16 }
 0x19a   : > { %p1175_p13 = scmp.ne.s32.totalorder %s1382_s2, %s1174_s16  ;;  %p1180_p2 = scmp.lt.u32.totalorder %s1174_s16, %s1382_s2 }
 0x19c   : > { %p1176_p0 = pnand %p1175_p13, %p1143_p5 }
 0x19e   : > { %p1177_p1 = pneg %p1176_p0 }
 0x1a0   : > { %p1182_p3 = pnand %p1180_p2, %p1177_p1 }
 0x1a2   : > { %1185 = shalt.err (!%p1182_p3)
}
 0x1a3   : > { %1136 = dma.vmem_to_hbm [thread:$0]  (%p1143_p5), %s842_s7, 16, %s1382_s2, [#allocation3]   ;;  %833 = vst [vmem:[#allocation4] sm:$0x1] %v832_v49 }
 0x1a4   : > { %s1186_s23 = scalar_lea.vmem %s1325_s9, 16  ;;  %s1192_s24 = scalar_lea.vmem %s1325_s9, 32 }
 0x1a5   : > { %p1187_p4 = scmp.ne.s32.totalorder %s1325_s9, %s1186_s23  ;;  %p1193_p8 = scmp.lt.s32.totalorder %s1325_s9, %s1325_s9 }
 0x1a6   : > { %p1194_p9 = scmp.lt.s32.totalorder %s1192_s24, %s1186_s23 }
 0x1a7   : > { %p1188_p6 = pnand %p1187_p4, %p1143_p5 }
 0x1a8   : > { %p1195_p10 = por %p1194_p9, %p1193_p8 }
 0x1a9   : > { %p1189_p7 = pneg %p1188_p6 }
 0x1ab   : > { %p1196_p11 = pnand %p1195_p10, %p1189_p7 }
 0x1ad   : > { %1199 = shalt.err (!%p1196_p11)
}
 0x1ae   : > { %s1200_s27 = scalar_lea.hbm %s1383_s3, 16 }
 0x1af   : > { %p1201_p12 = scmp.ne.s32.totalorder %s1383_s3, %s1200_s27  ;;  %p1206_p1 = scmp.lt.u32.totalorder %s1200_s27, %s1383_s3 }
 0x1b1   : > { %p1202_p13 = pnand %p1201_p12, %p1143_p5 }
 0x1b3   : > { %p1203_p0 = pneg %p1202_p13 }
 0x1b5   : > { %p1208_p2 = pnand %p1206_p1, %p1203_p0 }
 0x1b7   : > { %1211 = shalt.err (!%p1208_p2)
}
 0x1b8   : > { %1138 = dma.vmem_to_hbm [thread:$0]  (%p1143_p5), %s1325_s9, 16, %s1383_s3, [#allocation5]  }
 0x1b9   : > { %1217 = dma.done.wait (%p1143_p5), [#allocation3], 16  }
 0x1ba   : > { %1219 = vsyncadd (%p1143_p5), [#allocation3], 4294967280 }
 0x1bb   : > { %1221 = dma.done.wait (%p1143_p5), [#allocation5], 16  }
 0x1bc   : > { %1223 = vsyncadd (%p1143_p5), [#allocation5], 4294967280 }
 0x1bd PF: > { %s16_s12 = sadd.s32 1, %s1226_s12  }
 0x1be   : > { %p13_p3 = scmp.ge.s32.totalorder %s16_s12, 4  }
 0x1c0   :  { %15 = sbr.rel (!%p13_p3) target bundleno = 2 (0x2), region = 67 }
 0x1c7   :  { %869 = vsyncpa [#allocation3], 1 }
 0x1c8   :  { %871 = vsyncpa [#allocation3 + $0x1], 1 }
 0x1c9   :  { %872 = vsyncpa [#allocation5], 1 }

</bundles_post_ra>
